<compile_context>
chip_gen: v7x
topology: tpu7x:2x2x1
jax: 0.10.0
libtpu: 0.0.40
codegen_flags: <defaults>
</compile_context>

<pallas_src>
import functools
import math

import jax
import jax.numpy as jnp
import numpy as np
from jax.experimental import pallas as pl
from jax.experimental.pallas import tpu as pltpu


def _fused_attention_kernel(q_ref, k_ref, v_ref, bias_ref,
                            wq_ref, wk_ref, wv_ref, wfc_ref, bfc_ref,
                            o_ref, *, heads, scale):
    """One grid step == `B` batch elements.

    Ref shapes:
      q_ref            : (B, Lq, E)  bf16
      k_ref, v_ref     : (B, Lk, E)  bf16
      bias_ref         : (B, Lq, Lk) f32   additive mask (0 / -1e20)
      wq/wk/wv_ref     : (E, E)      bf16  block-diag per-head weights (pre-T)
      wfc_ref          : (E, E)      bf16  fc_out weight (pre-T)
      bfc_ref          : (1, E)      f32
      o_ref            : (B, Lq, E)  f32
    """
    B, Lq, E = q_ref.shape
    Lk = k_ref.shape[1]
    Dh = E // heads

    def project(x_ref, w_ref):
        # Lane-dense (B*L, E) @ (E, E); block-diag weight applies the per-head
        # Dh x Dh projection without any head split / relayout.
        L = x_ref.shape[1]
        x2 = x_ref[...].reshape(B * L, E)
        y = jnp.dot(x2, w_ref[...], preferred_element_type=jnp.float32)
        return y.astype(jnp.bfloat16).reshape(B, L, E)

    q_p = project(q_ref, wq_ref)          # (B, Lq, E)
    k_p = project(k_ref, wk_ref)          # (B, Lk, E)
    v_p = project(v_ref, wv_ref)          # (B, Lk, E)

    bias = bias_ref[...]                  # (B, Lq, Lk) f32
    scale_f32 = jnp.float32(scale)

    ctx_heads = []
    for h in range(heads):                # static, fully unrolled
        lo = h * Dh
        q_h = q_p[:, :, lo:lo + Dh]       # (B, Lq, Dh) bf16
        k_h = k_p[:, :, lo:lo + Dh]       # (B, Lk, Dh) bf16
        v_h = v_p[:, :, lo:lo + Dh]       # (B, Lk, Dh) bf16

        # energy[b, q, k] = <q_h[b, q, :], k_h[b, k, :]>  (f32 accumulation)
        s = jnp.einsum('bqd,bkd->bqk', q_h, k_h,
                       preferred_element_type=jnp.float32)
        # additive mask (== masked_fill(mask==0, -1e20) in f32), then scale,
        # exactly matching the torch order of operations.
        s = (s + bias) * scale_f32

        # softmax over keys, all in f32
        m = jnp.max(s, axis=-1, keepdims=True)
        e = jnp.exp(s - m)
        denom = jnp.sum(e, axis=-1, keepdims=True)
        attn = e * pl.reciprocal(denom, approx=False)

        ctx_heads.append(
            jnp.einsum('bqk,bkd->bqd', attn.astype(jnp.bfloat16), v_h,
                       preferred_element_type=jnp.float32))       # (B, Lq, Dh)

    # head concat along the lane axis -> (B, Lq, E); no transpose needed.
    ctx = jnp.concatenate(ctx_heads, axis=-1).astype(jnp.bfloat16)

    out = jnp.dot(ctx.reshape(B * Lq, E), wfc_ref[...],
                  preferred_element_type=jnp.float32) + bfc_ref[...]
    o_ref[...] = out.reshape(B, Lq, E).astype(o_ref.dtype)


def self_attention_forward(values, keys, query, mask, params,
                           embed_size, heads, batch_block=None):
    N, Lq, _ = query.shape
    Lk = keys.shape[1]
    Lv = values.shape[1]

    # bf16 activations (halves Q/K/V HBM traffic); accumulation stays f32.
    q_bf = query.astype(jnp.bfloat16)
    k_bf = keys.astype(jnp.bfloat16)
    v_bf = values.astype(jnp.bfloat16)

    # Additive f32 mask bias: 0 where attended, -1e20 where masked.  One
    # (Lq, Lk) tile per batch (assumes the usual head-broadcastable mask).
    if mask is None:
        bias = jnp.zeros((N, Lq, Lk), dtype=jnp.float32)
    else:
        m = jnp.broadcast_to(mask, (N, 1, Lq, Lk)).reshape(N, Lq, Lk)
        bias = jnp.where(m == 0, jnp.float32(-1e20), jnp.float32(0.0))

    # Per-head (Dh, Dh) projection weights expanded ONCE into block-diagonal
    # (E, E) matrices (and pre-transposed), so the kernel's projections are
    # lane-dense matmuls with no head split.
    # TODO(synk): for very large E on v7x, keep per-head weights and tile
    # instead of materialising the (E, E) block-diagonal form.
    eye_h = jnp.eye(heads, dtype=params["wq"].dtype)
    wq_blk = jnp.kron(eye_h, params["wq"].T).astype(jnp.bfloat16)
    wk_blk = jnp.kron(eye_h, params["wk"].T).astype(jnp.bfloat16)
    wv_blk = jnp.kron(eye_h, params["wv"].T).astype(jnp.bfloat16)
    wfc_t = params["w_fc"].T.astype(jnp.bfloat16)
    b_fc = params["b_fc"].reshape(1, embed_size).astype(jnp.float32)

    # Batch block: fatten the projection M dimension (B*L rows) while keeping
    # the block divisible into N.
    if batch_block is None:
        batch_block = min(N, max(1, 256 // max(Lq, 1)))
        while N % batch_block:
            batch_block -= 1
    B = batch_block
    grid = (N // B,)

    # VMEM budget: actual block footprint with headroom, capped well below
    # v7x's 64 MiB physical VMEM.
    blk_bytes = (
        2 * (B * (Lq + Lk + Lv) * embed_size) * 2      # q/k/v bf16, double-buffered
        + 2 * (B * Lq * Lk) * 4                        # mask bias f32
        + 4 * embed_size * embed_size * 2              # weights bf16
        + embed_size * 4                               # fc bias
        + 2 * (B * Lq * embed_size) * 4                # output f32
    )
    vmem_limit = int(min(48 << 20, max(32 << 20, 4 * blk_bytes)))

    kernel = functools.partial(_fused_attention_kernel,
                               heads=heads,
                               scale=1.0 / math.sqrt(embed_size))

    out = pl.pallas_call(
        kernel,
        out_shape=jax.ShapeDtypeStruct((N, Lq, embed_size), jnp.float32),
        grid=grid,
        in_specs=[
            pl.BlockSpec((B, Lq, embed_size), lambda n: (n, 0, 0)),
            pl.BlockSpec((B, Lk, embed_size), lambda n: (n, 0, 0)),
            pl.BlockSpec((B, Lv, embed_size), lambda n: (n, 0, 0)),
            pl.BlockSpec((B, Lq, Lk), lambda n: (n, 0, 0)),
            pl.BlockSpec((embed_size, embed_size), lambda n: (0, 0)),
            pl.BlockSpec((embed_size, embed_size), lambda n: (0, 0)),
            pl.BlockSpec((embed_size, embed_size), lambda n: (0, 0)),
            pl.BlockSpec((embed_size, embed_size), lambda n: (0, 0)),
            pl.BlockSpec((1, embed_size), lambda n: (0, 0)),
        ],
        out_specs=pl.BlockSpec((B, Lq, embed_size), lambda n: (n, 0, 0)),
        compiler_params=pltpu.CompilerParams(
            dimension_semantics=("parallel",),
            vmem_limit_bytes=vmem_limit),
    )(q_bf, k_bf, v_bf, bias, wq_blk, wk_blk, wv_blk, wfc_t, b_fc)

    return out


def _reference(values, keys, query, mask, params, embed_size, heads):
    # Pure-JAX (f32) reference mirroring the PyTorch forward.
    N, Lq, _ = query.shape
    Lk, Lv = keys.shape[1], values.shape[1]
    Dh = embed_size // heads
    v = values.reshape(N, Lv, heads, Dh) @ params["wv"].T
    k = keys.reshape(N, Lk, heads, Dh) @ params["wk"].T
    q = query.reshape(N, Lq, heads, Dh) @ params["wq"].T
    energy = jnp.einsum("nqhd,nkhd->nhqk", q, k)
    if mask is not None:
        energy = jnp.where(mask == 0, -1e20, energy)
    attn = jax.nn.softmax(energy / math.sqrt(embed_size), axis=3)
    out = jnp.einsum("nhql,nlhd->nqhd", attn, v).reshape(N, Lq, heads * Dh)
    return out @ params["w_fc"].T + params["b_fc"]


if __name__ == "__main__":
    N, L, embed_size, heads = 2, 8, 32, 4
    Dh = embed_size // heads

    key = jax.random.PRNGKey(0)
    kv, kk, kq, kwv, kwk, kwq, kwf, kbf = jax.random.split(key, 8)

    values = jax.random.normal(kv, (N, L, embed_size), dtype=jnp.float32)
    keys_in = jax.random.normal(kk, (N, L, embed_size), dtype=jnp.float32)
    query = jax.random.normal(kq, (N, L, embed_size), dtype=jnp.float32)

    # causal mask, broadcastable to (N, heads, Lq, Lk) like the torch version
    causal = jnp.tril(jnp.ones((L, L), dtype=jnp.int32))
    mask = jnp.broadcast_to(causal, (N, 1, L, L))

    params = {
        "wv": 0.1 * jax.random.normal(kwv, (Dh, Dh), dtype=jnp.float32),
        "wk": 0.1 * jax.random.normal(kwk, (Dh, Dh), dtype=jnp.float32),
        "wq": 0.1 * jax.random.normal(kwq, (Dh, Dh), dtype=jnp.float32),
        "w_fc": 0.1 * jax.random.normal(kwf, (embed_size, embed_size),
                                        dtype=jnp.float32),
        "b_fc": 0.1 * jax.random.normal(kbf, (embed_size,), dtype=jnp.float32),
    }

    out = self_attention_forward(values, keys_in, query, mask, params,
                                 embed_size, heads)
    out = jax.block_until_ready(out)

    ref = _reference(values, keys_in, query, mask, params, embed_size, heads)
    # Tolerance accounts for bf16 MXU operands (f32 accumulation / softmax).
    np.testing.assert_allclose(np.asarray(out), np.asarray(ref),
                               rtol=2e-2, atol=2e-2)

    print("KERNEL_OK")
</pallas_src>

<mosaic_0001>
module attributes {stable_mosaic.version = 11 : i64} {
  func.func @_fused_attention_kernel(%arg0: i32, %arg1: memref<2x8x32xbf16, #tpu.memory_space<vmem>>, %arg2: memref<2x8x32xbf16, #tpu.memory_space<vmem>>, %arg3: memref<2x8x32xbf16, #tpu.memory_space<vmem>>, %arg4: memref<2x8x8xf32, #tpu.memory_space<vmem>>, %arg5: memref<32x32xbf16, #tpu.memory_space<vmem>>, %arg6: memref<32x32xbf16, #tpu.memory_space<vmem>>, %arg7: memref<32x32xbf16, #tpu.memory_space<vmem>>, %arg8: memref<32x32xbf16, #tpu.memory_space<vmem>>, %arg9: memref<1x32xf32, #tpu.memory_space<vmem>>, %arg10: memref<2x8x32xf32, #tpu.memory_space<vmem>>) attributes {dimension_semantics = [#tpu.dimension_semantics<parallel>], iteration_bounds = array<i64: 1>, scalar_prefetch = 0 : i64, scratch_operands = 0 : i64, tpu.core_type = #tpu.core_type<tc>, window_params = [{transform_indices = @transform_0, window_bounds = array<i64: 2, 8, 32>}, {transform_indices = @transform_1, window_bounds = array<i64: 2, 8, 32>}, {transform_indices = @transform_2, window_bounds = array<i64: 2, 8, 32>}, {transform_indices = @transform_3, window_bounds = array<i64: 2, 8, 8>}, {pipeline_mode = #tpu.pipeline_mode<synchronous>, transform_indices = @transform_4, window_bounds = array<i64: 32, 32>}, {pipeline_mode = #tpu.pipeline_mode<synchronous>, transform_indices = @transform_5, window_bounds = array<i64: 32, 32>}, {pipeline_mode = #tpu.pipeline_mode<synchronous>, transform_indices = @transform_6, window_bounds = array<i64: 32, 32>}, {pipeline_mode = #tpu.pipeline_mode<synchronous>, transform_indices = @transform_7, window_bounds = array<i64: 32, 32>}, {pipeline_mode = #tpu.pipeline_mode<synchronous>, transform_indices = @transform_8, window_bounds = array<i64: 1, 32>}, {transform_indices = @transform_9, window_bounds = array<i64: 2, 8, 32>}]} {
    %c0 = arith.constant 0 : index
    %c0_0 = arith.constant 0 : index
    %c0_1 = arith.constant 0 : index
    %0 = vector.load %arg1[%c0, %c0_0, %c0_1] : memref<2x8x32xbf16, #tpu.memory_space<vmem>>, vector<2x8x32xbf16>
    %1 = vector.shape_cast %0 : vector<2x8x32xbf16> to vector<16x32xbf16>
    %c0_2 = arith.constant 0 : index
    %c0_3 = arith.constant 0 : index
    %2 = vector.load %arg5[%c0_2, %c0_3] : memref<32x32xbf16, #tpu.memory_space<vmem>>, vector<32x32xbf16>
    %cst = arith.constant dense<0.000000e+00> : vector<16x32xf32>
    %3 = tpu.matmul %1, %2, %cst {dimension_numbers = #tpu.dot_dimension_numbers<[1], [0], [0], [1], [0, 0, 1, 1], [], []>} : vector<16x32xbf16>, vector<32x32xbf16>, vector<16x32xf32> -> vector<16x32xf32>
    %4 = arith.truncf %3 : vector<16x32xf32> to vector<16x32xbf16>
    %5 = vector.shape_cast %4 : vector<16x32xbf16> to vector<2x8x32xbf16>
    %c0_4 = arith.constant 0 : index
    %c0_5 = arith.constant 0 : index
    %c0_6 = arith.constant 0 : index
    %6 = vector.load %arg2[%c0_4, %c0_5, %c0_6] : memref<2x8x32xbf16, #tpu.memory_space<vmem>>, vector<2x8x32xbf16>
    %7 = vector.shape_cast %6 : vector<2x8x32xbf16> to vector<16x32xbf16>
    %c0_7 = arith.constant 0 : index
    %c0_8 = arith.constant 0 : index
    %8 = vector.load %arg6[%c0_7, %c0_8] : memref<32x32xbf16, #tpu.memory_space<vmem>>, vector<32x32xbf16>
    %cst_9 = arith.constant dense<0.000000e+00> : vector<16x32xf32>
    %9 = tpu.matmul %7, %8, %cst_9 {dimension_numbers = #tpu.dot_dimension_numbers<[1], [0], [0], [1], [0, 0, 1, 1], [], []>} : vector<16x32xbf16>, vector<32x32xbf16>, vector<16x32xf32> -> vector<16x32xf32>
    %10 = arith.truncf %9 : vector<16x32xf32> to vector<16x32xbf16>
    %11 = vector.shape_cast %10 : vector<16x32xbf16> to vector<2x8x32xbf16>
    %c0_10 = arith.constant 0 : index
    %c0_11 = arith.constant 0 : index
    %c0_12 = arith.constant 0 : index
    %12 = vector.load %arg3[%c0_10, %c0_11, %c0_12] : memref<2x8x32xbf16, #tpu.memory_space<vmem>>, vector<2x8x32xbf16>
    %13 = vector.shape_cast %12 : vector<2x8x32xbf16> to vector<16x32xbf16>
    %c0_13 = arith.constant 0 : index
    %c0_14 = arith.constant 0 : index
    %14 = vector.load %arg7[%c0_13, %c0_14] : memref<32x32xbf16, #tpu.memory_space<vmem>>, vector<32x32xbf16>
    %cst_15 = arith.constant dense<0.000000e+00> : vector<16x32xf32>
    %15 = tpu.matmul %13, %14, %cst_15 {dimension_numbers = #tpu.dot_dimension_numbers<[1], [0], [0], [1], [0, 0, 1, 1], [], []>} : vector<16x32xbf16>, vector<32x32xbf16>, vector<16x32xf32> -> vector<16x32xf32>
    %16 = arith.truncf %15 : vector<16x32xf32> to vector<16x32xbf16>
    %17 = vector.shape_cast %16 : vector<16x32xbf16> to vector<2x8x32xbf16>
    %c0_16 = arith.constant 0 : index
    %c0_17 = arith.constant 0 : index
    %c0_18 = arith.constant 0 : index
    %18 = vector.load %arg4[%c0_16, %c0_17, %c0_18] : memref<2x8x8xf32, #tpu.memory_space<vmem>>, vector<2x8x8xf32>
    %19 = vector.extract_strided_slice %5 {offsets = [0, 0, 0], sizes = [2, 8, 8], strides = [1, 1, 1]} : vector<2x8x32xbf16> to vector<2x8x8xbf16>
    %20 = vector.extract_strided_slice %11 {offsets = [0, 0, 0], sizes = [2, 8, 8], strides = [1, 1, 1]} : vector<2x8x32xbf16> to vector<2x8x8xbf16>
    %21 = vector.extract_strided_slice %17 {offsets = [0, 0, 0], sizes = [2, 8, 8], strides = [1, 1, 1]} : vector<2x8x32xbf16> to vector<2x8x8xbf16>
    "tpu.trace_start"() <{level = 10 : i32, message = "bqd,bkd->bqk"}> : () -> ()
    %cst_19 = arith.constant dense<0.000000e+00> : vector<2x8x8xf32>
    %22 = tpu.matmul %19, %20, %cst_19 {dimension_numbers = #tpu.dot_dimension_numbers<[2], [2], [1], [1], [0, 0, 0, 1, 1, 1], [0], [0]>} : vector<2x8x8xbf16>, vector<2x8x8xbf16>, vector<2x8x8xf32> -> vector<2x8x8xf32>
    "tpu.trace_stop"() : () -> ()
    %23 = arith.addf %22, %18 : vector<2x8x8xf32>
    %cst_20 = arith.constant 0.176776692 : f32
    %24 = vector.broadcast %cst_20 : f32 to vector<2x8x8xf32>
    %25 = arith.mulf %23, %24 : vector<2x8x8xf32>
    %cst_21 = arith.constant dense<0xFF800000> : vector<2x8xf32>
    %26 = vector.multi_reduction <maximumf>, %25, %cst_21 [2] : vector<2x8x8xf32> to vector<2x8xf32>
    %27 = vector.shape_cast %26 : vector<2x8xf32> to vector<2x8x1xf32>
    %28 = vector.broadcast %27 : vector<2x8x1xf32> to vector<2x8x8xf32>
    %29 = arith.subf %25, %28 : vector<2x8x8xf32>
    %30 = math.exp %29 : vector<2x8x8xf32>
    %cst_22 = arith.constant dense<0.000000e+00> : vector<2x8xf32>
    %31 = vector.multi_reduction <add>, %30, %cst_22 [2] : vector<2x8x8xf32> to vector<2x8xf32>
    %32 = vector.shape_cast %31 : vector<2x8xf32> to vector<2x8x1xf32>
    %33 = tpu.reciprocal %32 : vector<2x8x1xf32> -> vector<2x8x1xf32>
    %34 = vector.broadcast %33 : vector<2x8x1xf32> to vector<2x8x8xf32>
    %35 = arith.mulf %30, %34 : vector<2x8x8xf32>
    %36 = arith.truncf %35 : vector<2x8x8xf32> to vector<2x8x8xbf16>
    "tpu.trace_start"() <{level = 10 : i32, message = "bqk,bkd->bqd"}> : () -> ()
    %cst_23 = arith.constant dense<0.000000e+00> : vector<2x8x8xf32>
    %37 = tpu.matmul %36, %21, %cst_23 {dimension_numbers = #tpu.dot_dimension_numbers<[2], [1], [1], [2], [0, 0, 0, 1, 1, 2], [0], [0]>} : vector<2x8x8xbf16>, vector<2x8x8xbf16>, vector<2x8x8xf32> -> vector<2x8x8xf32>
    "tpu.trace_stop"() : () -> ()
    %38 = vector.extract_strided_slice %5 {offsets = [0, 0, 8], sizes = [2, 8, 8], strides = [1, 1, 1]} : vector<2x8x32xbf16> to vector<2x8x8xbf16>
    %39 = vector.extract_strided_slice %11 {offsets = [0, 0, 8], sizes = [2, 8, 8], strides = [1, 1, 1]} : vector<2x8x32xbf16> to vector<2x8x8xbf16>
    %40 = vector.extract_strided_slice %17 {offsets = [0, 0, 8], sizes = [2, 8, 8], strides = [1, 1, 1]} : vector<2x8x32xbf16> to vector<2x8x8xbf16>
    "tpu.trace_start"() <{level = 10 : i32, message = "bqd,bkd->bqk"}> : () -> ()
    %cst_24 = arith.constant dense<0.000000e+00> : vector<2x8x8xf32>
    %41 = tpu.matmul %38, %39, %cst_24 {dimension_numbers = #tpu.dot_dimension_numbers<[2], [2], [1], [1], [0, 0, 0, 1, 1, 1], [0], [0]>} : vector<2x8x8xbf16>, vector<2x8x8xbf16>, vector<2x8x8xf32> -> vector<2x8x8xf32>
    "tpu.trace_stop"() : () -> ()
    %42 = arith.addf %41, %18 : vector<2x8x8xf32>
    %cst_25 = arith.constant 0.176776692 : f32
    %43 = vector.broadcast %cst_25 : f32 to vector<2x8x8xf32>
    %44 = arith.mulf %42, %43 : vector<2x8x8xf32>
    %cst_26 = arith.constant dense<0xFF800000> : vector<2x8xf32>
    %45 = vector.multi_reduction <maximumf>, %44, %cst_26 [2] : vector<2x8x8xf32> to vector<2x8xf32>
    %46 = vector.shape_cast %45 : vector<2x8xf32> to vector<2x8x1xf32>
    %47 = vector.broadcast %46 : vector<2x8x1xf32> to vector<2x8x8xf32>
    %48 = arith.subf %44, %47 : vector<2x8x8xf32>
    %49 = math.exp %48 : vector<2x8x8xf32>
    %cst_27 = arith.constant dense<0.000000e+00> : vector<2x8xf32>
    %50 = vector.multi_reduction <add>, %49, %cst_27 [2] : vector<2x8x8xf32> to vector<2x8xf32>
    %51 = vector.shape_cast %50 : vector<2x8xf32> to vector<2x8x1xf32>
    %52 = tpu.reciprocal %51 : vector<2x8x1xf32> -> vector<2x8x1xf32>
    %53 = vector.broadcast %52 : vector<2x8x1xf32> to vector<2x8x8xf32>
    %54 = arith.mulf %49, %53 : vector<2x8x8xf32>
    %55 = arith.truncf %54 : vector<2x8x8xf32> to vector<2x8x8xbf16>
    "tpu.trace_start"() <{level = 10 : i32, message = "bqk,bkd->bqd"}> : () -> ()
    %cst_28 = arith.constant dense<0.000000e+00> : vector<2x8x8xf32>
    %56 = tpu.matmul %55, %40, %cst_28 {dimension_numbers = #tpu.dot_dimension_numbers<[2], [1], [1], [2], [0, 0, 0, 1, 1, 2], [0], [0]>} : vector<2x8x8xbf16>, vector<2x8x8xbf16>, vector<2x8x8xf32> -> vector<2x8x8xf32>
    "tpu.trace_stop"() : () -> ()
    %57 = vector.extract_strided_slice %5 {offsets = [0, 0, 16], sizes = [2, 8, 8], strides = [1, 1, 1]} : vector<2x8x32xbf16> to vector<2x8x8xbf16>
    %58 = vector.extract_strided_slice %11 {offsets = [0, 0, 16], sizes = [2, 8, 8], strides = [1, 1, 1]} : vector<2x8x32xbf16> to vector<2x8x8xbf16>
    %59 = vector.extract_strided_slice %17 {offsets = [0, 0, 16], sizes = [2, 8, 8], strides = [1, 1, 1]} : vector<2x8x32xbf16> to vector<2x8x8xbf16>
    "tpu.trace_start"() <{level = 10 : i32, message = "bqd,bkd->bqk"}> : () -> ()
    %cst_29 = arith.constant dense<0.000000e+00> : vector<2x8x8xf32>
    %60 = tpu.matmul %57, %58, %cst_29 {dimension_numbers = #tpu.dot_dimension_numbers<[2], [2], [1], [1], [0, 0, 0, 1, 1, 1], [0], [0]>} : vector<2x8x8xbf16>, vector<2x8x8xbf16>, vector<2x8x8xf32> -> vector<2x8x8xf32>
    "tpu.trace_stop"() : () -> ()
    %61 = arith.addf %60, %18 : vector<2x8x8xf32>
    %cst_30 = arith.constant 0.176776692 : f32
    %62 = vector.broadcast %cst_30 : f32 to vector<2x8x8xf32>
    %63 = arith.mulf %61, %62 : vector<2x8x8xf32>
    %cst_31 = arith.constant dense<0xFF800000> : vector<2x8xf32>
    %64 = vector.multi_reduction <maximumf>, %63, %cst_31 [2] : vector<2x8x8xf32> to vector<2x8xf32>
    %65 = vector.shape_cast %64 : vector<2x8xf32> to vector<2x8x1xf32>
    %66 = vector.broadcast %65 : vector<2x8x1xf32> to vector<2x8x8xf32>
    %67 = arith.subf %63, %66 : vector<2x8x8xf32>
    %68 = math.exp %67 : vector<2x8x8xf32>
    %cst_32 = arith.constant dense<0.000000e+00> : vector<2x8xf32>
    %69 = vector.multi_reduction <add>, %68, %cst_32 [2] : vector<2x8x8xf32> to vector<2x8xf32>
    %70 = vector.shape_cast %69 : vector<2x8xf32> to vector<2x8x1xf32>
    %71 = tpu.reciprocal %70 : vector<2x8x1xf32> -> vector<2x8x1xf32>
    %72 = vector.broadcast %71 : vector<2x8x1xf32> to vector<2x8x8xf32>
    %73 = arith.mulf %68, %72 : vector<2x8x8xf32>
    %74 = arith.truncf %73 : vector<2x8x8xf32> to vector<2x8x8xbf16>
    "tpu.trace_start"() <{level = 10 : i32, message = "bqk,bkd->bqd"}> : () -> ()
    %cst_33 = arith.constant dense<0.000000e+00> : vector<2x8x8xf32>
    %75 = tpu.matmul %74, %59, %cst_33 {dimension_numbers = #tpu.dot_dimension_numbers<[2], [1], [1], [2], [0, 0, 0, 1, 1, 2], [0], [0]>} : vector<2x8x8xbf16>, vector<2x8x8xbf16>, vector<2x8x8xf32> -> vector<2x8x8xf32>
    "tpu.trace_stop"() : () -> ()
    %76 = vector.extract_strided_slice %5 {offsets = [0, 0, 24], sizes = [2, 8, 8], strides = [1, 1, 1]} : vector<2x8x32xbf16> to vector<2x8x8xbf16>
    %77 = vector.extract_strided_slice %11 {offsets = [0, 0, 24], sizes = [2, 8, 8], strides = [1, 1, 1]} : vector<2x8x32xbf16> to vector<2x8x8xbf16>
    %78 = vector.extract_strided_slice %17 {offsets = [0, 0, 24], sizes = [2, 8, 8], strides = [1, 1, 1]} : vector<2x8x32xbf16> to vector<2x8x8xbf16>
    "tpu.trace_start"() <{level = 10 : i32, message = "bqd,bkd->bqk"}> : () -> ()
    %cst_34 = arith.constant dense<0.000000e+00> : vector<2x8x8xf32>
    %79 = tpu.matmul %76, %77, %cst_34 {dimension_numbers = #tpu.dot_dimension_numbers<[2], [2], [1], [1], [0, 0, 0, 1, 1, 1], [0], [0]>} : vector<2x8x8xbf16>, vector<2x8x8xbf16>, vector<2x8x8xf32> -> vector<2x8x8xf32>
    "tpu.trace_stop"() : () -> ()
    %80 = arith.addf %79, %18 : vector<2x8x8xf32>
    %cst_35 = arith.constant 0.176776692 : f32
    %81 = vector.broadcast %cst_35 : f32 to vector<2x8x8xf32>
    %82 = arith.mulf %80, %81 : vector<2x8x8xf32>
    %cst_36 = arith.constant dense<0xFF800000> : vector<2x8xf32>
    %83 = vector.multi_reduction <maximumf>, %82, %cst_36 [2] : vector<2x8x8xf32> to vector<2x8xf32>
    %84 = vector.shape_cast %83 : vector<2x8xf32> to vector<2x8x1xf32>
    %85 = vector.broadcast %84 : vector<2x8x1xf32> to vector<2x8x8xf32>
    %86 = arith.subf %82, %85 : vector<2x8x8xf32>
    %87 = math.exp %86 : vector<2x8x8xf32>
    %cst_37 = arith.constant dense<0.000000e+00> : vector<2x8xf32>
    %88 = vector.multi_reduction <add>, %87, %cst_37 [2] : vector<2x8x8xf32> to vector<2x8xf32>
    %89 = vector.shape_cast %88 : vector<2x8xf32> to vector<2x8x1xf32>
    %90 = tpu.reciprocal %89 : vector<2x8x1xf32> -> vector<2x8x1xf32>
    %91 = vector.broadcast %90 : vector<2x8x1xf32> to vector<2x8x8xf32>
    %92 = arith.mulf %87, %91 : vector<2x8x8xf32>
    %93 = arith.truncf %92 : vector<2x8x8xf32> to vector<2x8x8xbf16>
    "tpu.trace_start"() <{level = 10 : i32, message = "bqk,bkd->bqd"}> : () -> ()
    %cst_38 = arith.constant dense<0.000000e+00> : vector<2x8x8xf32>
    %94 = tpu.matmul %93, %78, %cst_38 {dimension_numbers = #tpu.dot_dimension_numbers<[2], [1], [1], [2], [0, 0, 0, 1, 1, 2], [0], [0]>} : vector<2x8x8xbf16>, vector<2x8x8xbf16>, vector<2x8x8xf32> -> vector<2x8x8xf32>
    "tpu.trace_stop"() : () -> ()
    %95 = tpu.concatenate %37, %56, %75, %94 in 2 : vector<2x8x8xf32>, vector<2x8x8xf32>, vector<2x8x8xf32>, vector<2x8x8xf32> -> vector<2x8x32xf32>
    %96 = arith.truncf %95 : vector<2x8x32xf32> to vector<2x8x32xbf16>
    %97 = vector.shape_cast %96 : vector<2x8x32xbf16> to vector<16x32xbf16>
    %c0_39 = arith.constant 0 : index
    %c0_40 = arith.constant 0 : index
    %98 = vector.load %arg8[%c0_39, %c0_40] : memref<32x32xbf16, #tpu.memory_space<vmem>>, vector<32x32xbf16>
    %cst_41 = arith.constant dense<0.000000e+00> : vector<16x32xf32>
    %99 = tpu.matmul %97, %98, %cst_41 {dimension_numbers = #tpu.dot_dimension_numbers<[1], [0], [0], [1], [0, 0, 1, 1], [], []>} : vector<16x32xbf16>, vector<32x32xbf16>, vector<16x32xf32> -> vector<16x32xf32>
    %c0_42 = arith.constant 0 : index
    %c0_43 = arith.constant 0 : index
    %100 = vector.load %arg9[%c0_42, %c0_43] : memref<1x32xf32, #tpu.memory_space<vmem>>, vector<1x32xf32>
    %101 = vector.broadcast %100 : vector<1x32xf32> to vector<16x32xf32>
    %102 = arith.addf %99, %101 : vector<16x32xf32>
    %103 = vector.shape_cast %102 : vector<16x32xf32> to vector<2x8x32xf32>
    %c0_44 = arith.constant 0 : index
    %c0_45 = arith.constant 0 : index
    %c0_46 = arith.constant 0 : index
    %104 = vector.load %arg10[%c0_44, %c0_45, %c0_46] : memref<2x8x32xf32, #tpu.memory_space<vmem>>, vector<2x8x32xf32>
    tpu.vector_store %arg10[%c0_44, %c0_45, %c0_46], %103 {strides = array<i32>} : memref<2x8x32xf32, #tpu.memory_space<vmem>>, vector<2x8x32xf32>,
    return
  }
  func.func @transform_0(%arg0: i32) -> (i32, i32, i32) {
    %c0_i32 = arith.constant 0 : i32
    %c0_i32_0 = arith.constant 0 : i32
    %c0_i32_1 = arith.constant 0 : i32
    return %arg0, %c0_i32, %c0_i32_0 : i32, i32, i32
  }
  func.func @transform_1(%arg0: i32) -> (i32, i32, i32) {
    %c0_i32 = arith.constant 0 : i32
    %c0_i32_0 = arith.constant 0 : i32
    %c0_i32_1 = arith.constant 0 : i32
    return %arg0, %c0_i32, %c0_i32_0 : i32, i32, i32
  }
  func.func @transform_2(%arg0: i32) -> (i32, i32, i32) {
    %c0_i32 = arith.constant 0 : i32
    %c0_i32_0 = arith.constant 0 : i32
    %c0_i32_1 = arith.constant 0 : i32
    return %arg0, %c0_i32, %c0_i32_0 : i32, i32, i32
  }
  func.func @transform_3(%arg0: i32) -> (i32, i32, i32) {
    %c0_i32 = arith.constant 0 : i32
    %c0_i32_0 = arith.constant 0 : i32
    %c0_i32_1 = arith.constant 0 : i32
    return %arg0, %c0_i32, %c0_i32_0 : i32, i32, i32
  }
  func.func @transform_4(%arg0: i32) -> (i32, i32) {
    %c0_i32 = arith.constant 0 : i32
    %c0_i32_0 = arith.constant 0 : i32
    %c0_i32_1 = arith.constant 0 : i32
    return %c0_i32, %c0_i32_0 : i32, i32
  }
  func.func @transform_5(%arg0: i32) -> (i32, i32) {
    %c0_i32 = arith.constant 0 : i32
    %c0_i32_0 = arith.constant 0 : i32
    %c0_i32_1 = arith.constant 0 : i32
    return %c0_i32, %c0_i32_0 : i32, i32
  }
  func.func @transform_6(%arg0: i32) -> (i32, i32) {
    %c0_i32 = arith.constant 0 : i32
    %c0_i32_0 = arith.constant 0 : i32
    %c0_i32_1 = arith.constant 0 : i32
    return %c0_i32, %c0_i32_0 : i32, i32
  }
  func.func @transform_7(%arg0: i32) -> (i32, i32) {
    %c0_i32 = arith.constant 0 : i32
    %c0_i32_0 = arith.constant 0 : i32
    %c0_i32_1 = arith.constant 0 : i32
    return %c0_i32, %c0_i32_0 : i32, i32
  }
  func.func @transform_8(%arg0: i32) -> (i32, i32) {
    %c0_i32 = arith.constant 0 : i32
    %c0_i32_0 = arith.constant 0 : i32
    %c0_i32_1 = arith.constant 0 : i32
    return %c0_i32, %c0_i32_0 : i32, i32
  }
  func.func @transform_9(%arg0: i32) -> (i32, i32, i32) {
    %c0_i32 = arith.constant 0 : i32
    %c0_i32_0 = arith.constant 0 : i32
    %c0_i32_1 = arith.constant 0 : i32
    return %arg0, %c0_i32, %c0_i32_0 : i32, i32, i32
  }
}

</mosaic_0001>

<bundles_post_ra>
// kernel: tpu_custom_call.1
= control target key start
LH: loop header
LB: loop body
LE: loop exit
PB: predicated region body
PF: predicated region fallthrough
CT: control target
= control target key end

     0   :  { %14 = vsyncpa [#allocation3], 0  ;;  %s2259_s0 = inlined_call_operand.hbm [shape: bf16[2,8,32], index: 0, kind: input, shape index: {}]   ;;  %s2260_s1 = inlined_call_operand.hbm [shape: bf16[2,8,32], index: 1, kind: input, shape index: {}]   ;;  %s2261_s2 = inlined_call_operand.hbm [shape: bf16[2,8,32], index: 2, kind: input, shape index: {}]   ;;  %s2262_s3 = inlined_call_operand.hbm [shape: f32[2,8,8], index: 3, kind: input, shape index: {}]   ;;  %s2263_s4 = inlined_call_operand.hbm [shape: bf16[32,32], index: 4, kind: input, shape index: {}]   ;;  %s2264_s5 = inlined_call_operand.vmem [shape: bf16[32,32], index: 5, kind: input, shape index: {}]   ;;  %s2265_s6 = inlined_call_operand.hbm [shape: bf16[32,32], index: 6, kind: input, shape index: {}]   ;;  %s2266_s7 = inlined_call_operand.hbm [shape: bf16[32,32], index: 7, kind: input, shape index: {}]   ;;  %s2267_s8 = inlined_call_operand.vmem [shape: f32[1,32], index: 8, kind: input, shape index: {}]   ;;  %s2268_s9 = inlined_call_operand.hbm [shape: f32[2,8,32], index: 9, kind: output, shape index: {}]  }
   0x1   :  { %15 = vsyncpa [#allocation6], 0 }
   0x2   :  { %16 = vsyncpa [#allocation9], 0 }
   0x3   :  { %17 = vsyncpa [#allocation12], 0 }
   0x4   :  { %18 = vsyncpa [#allocation4], 0  ;;  %s1838_s30 = smov [#allocation5]   ;;  %s1839_s11 = smov [#allocation8]  }
   0x5   :  { %s36_s10 = sshll.u32 %s1838_s30, 4  ;;  %s60_s12 = sshll.u32 %s1839_s11, 4  ;;  %s37_s10 = int_to_ptr.vmem [resolvable:$true] %s36_s10  ;;  %s1907_s12 = int_to_ptr.vmem [resolvable:$true] %s60_s12 }
   0x6   :  { %s1652_s15 = scalar_lea.hbm %s2260_s1, 128 }
   0x7   :  { %p1653_p0 = scmp.ne.s32.totalorder %s2260_s1, %s1652_s15  ;;  %p1656_p1 = scmp.lt.u32.totalorder %s1652_s15, %s2260_s1 }
   0x9   :  { %p1658_p2 = pnand %p1656_p1, %p1653_p0 }
   0xb   :  { %1661 = shalt.err (!%p1658_p2)
}
   0xc   :  { %s1662_s20 = scalar_lea.vmem %s37_s10, 128  ;;  %p1667_p4 = scmp.lt.s32.totalorder %s37_s10, %s37_s10 }
   0xd   :  { %p1663_p3 = scmp.ne.s32.totalorder %s37_s10, %s1662_s20  ;;  %p1668_p5 = scmp.lt.s32.totalorder %s1662_s20, %s1662_s20 }
   0xf   :  { %p1669_p6 = por %p1668_p5, %p1667_p4 }
  0x11   :  { %p1670_p7 = pnand %p1669_p6, %p1663_p3 }
  0x13   :  { %1673 = shalt.err (!%p1670_p7)
}
  0x14   :  { %s1840_s21 = smov 64   ;;  %s1841_s22 = smov 4  }
  0x15   :  { %42 = dma.hbm_to_vmem [thread:$0]  %s2260_s1, 128, %s37_s10, [#allocation6], %s1840_s21, %s1840_s21, %s1841_s22  }
  0x16   :  { %s1674_s27 = scalar_lea.hbm %s2262_s3, 256 }
  0x17   :  { %p1675_p8 = scmp.ne.s32.totalorder %s2262_s3, %s1674_s27  ;;  %p1678_p9 = scmp.lt.u32.totalorder %s1674_s27, %s2262_s3 }
  0x19   :  { %p1680_p10 = pnand %p1678_p9, %p1675_p8 }
  0x1b   :  { %1683 = shalt.err (!%p1680_p10)
}
  0x1c   :  { %s1684_s13 = scalar_lea.vmem %s1907_s12, 256  ;;  %p1689_p12 = scmp.lt.s32.totalorder %s1907_s12, %s1907_s12 }
  0x1d   :  { %p1685_p11 = scmp.ne.s32.totalorder %s1907_s12, %s1684_s13  ;;  %p1690_p13 = scmp.lt.s32.totalorder %s1684_s13, %s1684_s13 }
  0x1f   :  { %p1691_p0 = por %p1690_p13, %p1689_p12 }
  0x21   :  { %p1692_p1 = pnand %p1691_p0, %p1685_p11 }
  0x23   :  { %1695 = shalt.err (!%p1692_p1)
}
  0x24   :  { %s1842_s1 = smov 128   ;;  %s1843_s10 = smov 8  }
  0x25   :  { %66 = dma.hbm_to_vmem [thread:$0]  %s2262_s3, 256, %s1907_s12, [#allocation9], %s1842_s1, %s1842_s1, %s1843_s10  }
  0x26   :  { %s1844_s16 = smov [#allocation11]   ;;  %s1845_s18 = smov [#allocation2]  }
  0x27   :  { %s86_s17 = sshll.u32 %s1844_s16, 4  ;;  %s24_s19 = sshll.u32 %s1845_s18, 4  ;;  %s87_s17 = int_to_ptr.vmem [resolvable:$true] %s86_s17  ;;  %s1944_s19 = int_to_ptr.vmem [resolvable:$true] %s24_s19 }
  0x28   :  { %s1696_s24 = scalar_lea.hbm %s2265_s6, 256 }
  0x29   :  { %p1697_p2 = scmp.ne.s32.totalorder %s2265_s6, %s1696_s24  ;;  %p1700_p3 = scmp.lt.u32.totalorder %s1696_s24, %s2265_s6 }
  0x2b   :  { %p1702_p4 = pnand %p1700_p3, %p1697_p2 }
  0x2d   :  { %1705 = shalt.err (!%p1702_p4)
}
  0x2e   :  { %s1706_s3 = scalar_lea.vmem %s87_s17, 256  ;;  %p1711_p6 = scmp.lt.s32.totalorder %s87_s17, %s87_s17 }
  0x2f   :  { %p1707_p5 = scmp.ne.s32.totalorder %s87_s17, %s1706_s3  ;;  %p1712_p7 = scmp.lt.s32.totalorder %s1706_s3, %s1706_s3 }
  0x31   :  { %p1713_p8 = por %p1712_p7, %p1711_p6 }
  0x33   :  { %p1714_p9 = pnand %p1713_p8, %p1707_p5 }
  0x35   :  { %1717 = shalt.err (!%p1714_p9)
}
  0x36   :  { %92 = dma.hbm_to_vmem [thread:$0]  %s2265_s6, 256, %s87_s17, [#allocation12], %s1840_s21, %s1840_s21, %s1841_s22  }
  0x37   :  { %s1718_s13 = scalar_lea.hbm %s2259_s0, 128 }
  0x38   :  { %p1719_p10 = scmp.ne.s32.totalorder %s2259_s0, %s1718_s13  ;;  %p1722_p11 = scmp.lt.u32.totalorder %s1718_s13, %s2259_s0 }
  0x3a   :  { %p1724_p12 = pnand %p1722_p11, %p1719_p10 }
  0x3c   :  { %1727 = shalt.err (!%p1724_p12)
}
  0x3d   :  { %s1728_s20 = scalar_lea.vmem %s1944_s19, 128  ;;  %p1733_p0 = scmp.lt.s32.totalorder %s1944_s19, %s1944_s19 }
  0x3e   :  { %p1729_p13 = scmp.ne.s32.totalorder %s1944_s19, %s1728_s20  ;;  %p1734_p1 = scmp.lt.s32.totalorder %s1728_s20, %s1728_s20 }
  0x40   :  { %p1735_p2 = por %p1734_p1, %p1733_p0 }
  0x42   :  { %p1736_p3 = pnand %p1735_p2, %p1729_p13 }
  0x44   :  { %1739 = shalt.err (!%p1736_p3)
}
  0x45   :  { %30 = dma.hbm_to_vmem [thread:$0]  %s2259_s0, 128, %s1944_s19, [#allocation3], %s1840_s21, %s1840_s21, %s1841_s22  }
  0x46   :  { %s1846_s23 = smov [#allocation7]   ;;  %s1847_s25 = smov [#allocation10]  }
  0x47   :  { %s48_s24 = sshll.u32 %s1846_s23, 4  ;;  %s72_s26 = sshll.u32 %s1847_s25, 4  ;;  %s49_s24 = int_to_ptr.vmem [resolvable:$true] %s48_s24  ;;  %s1981_s26 = int_to_ptr.vmem [resolvable:$true] %s72_s26 }
  0x48   :  { %s1740_s3 = scalar_lea.hbm %s2261_s2, 128 }
  0x49   :  { %p1741_p4 = scmp.ne.s32.totalorder %s2261_s2, %s1740_s3  ;;  %p1744_p5 = scmp.lt.u32.totalorder %s1740_s3, %s2261_s2 }
  0x4b   :  { %p1746_p6 = pnand %p1744_p5, %p1741_p4 }
  0x4d   :  { %1749 = shalt.err (!%p1746_p6)
}
  0x4e   :  { %s1750_s0 = scalar_lea.vmem %s49_s24, 128  ;;  %p1755_p8 = scmp.lt.s32.totalorder %s49_s24, %s49_s24 }
  0x4f   :  { %p1751_p7 = scmp.ne.s32.totalorder %s49_s24, %s1750_s0  ;;  %p1756_p9 = scmp.lt.s32.totalorder %s1750_s0, %s1750_s0 }
  0x51   :  { %p1757_p10 = por %p1756_p9, %p1755_p8 }
  0x53   :  { %p1758_p11 = pnand %p1757_p10, %p1751_p7 }
  0x55   :  { %1761 = shalt.err (!%p1758_p11)
}
  0x56   :  { %54 = dma.hbm_to_vmem [thread:$0]  %s2261_s2, 128, %s49_s24, [#allocation6], %s1840_s21, %s1840_s21, %s1841_s22  }
  0x57   :  { %s1762_s16 = scalar_lea.hbm %s2263_s4, 256 }
  0x58   :  { %p1763_p12 = scmp.ne.s32.totalorder %s2263_s4, %s1762_s16  ;;  %p1766_p13 = scmp.lt.u32.totalorder %s1762_s16, %s2263_s4 }
  0x5a   :  { %p1768_p0 = pnand %p1766_p13, %p1763_p12 }
  0x5c   :  { %1771 = shalt.err (!%p1768_p0)
}
  0x5d   :  { %s1772_s23 = scalar_lea.vmem %s1981_s26, 256  ;;  %p1777_p2 = scmp.lt.s32.totalorder %s1981_s26, %s1981_s26 }
  0x5e   :  { %p1773_p1 = scmp.ne.s32.totalorder %s1981_s26, %s1772_s23  ;;  %p1778_p3 = scmp.lt.s32.totalorder %s1772_s23, %s1772_s23 }
  0x60   :  { %p1779_p4 = por %p1778_p3, %p1777_p2 }
  0x62   :  { %p1780_p5 = pnand %p1779_p4, %p1773_p1 }
  0x64   :  { %1783 = shalt.err (!%p1780_p5)
}
  0x65   :  { %78 = dma.hbm_to_vmem [thread:$0]  %s2263_s4, 256, %s1981_s26, [#allocation9], %s1840_s21, %s1840_s21, %s1841_s22  }
  0x66   :  { %s1848_s25 = smov [#allocation13]   ;;  %s1784_s12 = scalar_lea.hbm %s2266_s7, 256 }
  0x67   :  { %s98_s27 = sshll.u32 %s1848_s25, 4  ;;  %p1785_p6 = scmp.ne.s32.totalorder %s2266_s7, %s1784_s12  ;;  %s99_s27 = int_to_ptr.vmem [resolvable:$true] %s98_s27 }
  0x68   :  { %p1788_p7 = scmp.lt.u32.totalorder %s1784_s12, %s2266_s7 }
  0x6a   :  { %p1790_p8 = pnand %p1788_p7, %p1785_p6 }
  0x6c   :  { %1793 = shalt.err (!%p1790_p8)
}
  0x6d   :  { %s1794_s19 = scalar_lea.vmem %s99_s27, 256  ;;  %p1799_p10 = scmp.lt.s32.totalorder %s99_s27, %s99_s27 }
  0x6e   :  { %p1795_p9 = scmp.ne.s32.totalorder %s99_s27, %s1794_s19  ;;  %p1800_p11 = scmp.lt.s32.totalorder %s1794_s19, %s1794_s19 }
  0x70   :  { %p1801_p12 = por %p1800_p11, %p1799_p10 }
  0x72   :  { %p1802_p13 = pnand %p1801_p12, %p1795_p9 }
  0x74   :  { %1805 = shalt.err (!%p1802_p13)
}
  0x75   :  { %104 = dma.hbm_to_vmem [thread:$0]  %s2266_s7, 256, %s99_s27, [#allocation12], %s1840_s21, %s1840_s21, %s1841_s22  }
  0x76   :  { %1828 = dma.done.wait [#allocation3], 128  }
  0x77   :  { %1829 = vsyncadd [#allocation3], 4294967168 }
  0x78   :  { %1830 = dma.done.wait [#allocation6], 256  }
  0x79   :  { %1831 = vsyncadd [#allocation6], 4294967040 }
  0x7a   :  { %1832 = dma.done.wait [#allocation9], 512  }
  0x7b   :  { %1833 = vsyncadd [#allocation9], 4294966784 }
  0x7c   :  { %1834 = dma.done.wait [#allocation12], 512  }
  0x7d   :  { %1835 = vsyncadd [#allocation12], 4294966784  ;;  %v1849_v0 = vmov 0.0   ;;  %vm1850_vm0 = vmmov 0   ;;  %v1609_v1 = vld [vmem:[%s2264_s5] sm:$0xff]   ;;  %v1610_v2 = vld [vmem:[%s2264_s5 + $0x8] sm:$0xff]  }
  0x7e   :  { %1455 = vmatprep.subr.bf16.mxu1 %v1849_v0  ;;  %1447 = vmatprep.subr.bf16.mxu0 %v1849_v0  ;;  %v1611_v3 = vld [vmem:[#allocation10] sm:$0xff]   ;;  %v1613_v4 = vld [vmem:[#allocation10 + $0x8] sm:$0xff]   ;;  %vm152_vm1 = vcmask 261120   ;;  %v1614_v6 = vld [vmem:[#allocation2] sm:$0xff]   ;;  %vm351_vm2 = vcmask 64512   ;;  %s1851_s5 = smov 120  }
  0x7f   :  { %1459 = vmatprep.mubr.msk.bf16.mxu1 %vm1850_vm0, %v1849_v0  ;;  %1451 = vmatprep.mubr.msk.bf16.mxu0 %vm1850_vm0, %v1849_v0  ;;  %v1612_v5 = vld [vmem:[#allocation5] sm:$0xff]   ;;  %v1615_v7 = vld [vmem:[#allocation11] sm:$0xff]   ;;  %v1616_v8 = vld [vmem:[#allocation11 + $0x8] sm:$0xff]   ;;  %vm473_vm3 = vcmask 1043456   ;;  %s1852_s14 = smov 112   ;;  %s1853_s15 = smov 104  }
  0x80   :  { %1456 = vmatpush3.bf16.msra.mxu1 %v1609_v1  ;;  %1448 = vmatpush3.bf16.msra.mxu0 %v1611_v3  ;;  %v1617_v9 = vld [vmem:[#allocation7] sm:$0xff]   ;;  %v2094_v32 = vld [vmem:[#allocation8] sm:$0xff]  ;;  %v2096_v34 = vld [vmem:[#allocation8 + $0x8] sm:$0xff]  ;;  %s1854_s16 = smov 16   ;;  %s1855_s18 = smov 24   ;;  %vm1255_vm4 = vcmask 130048  }
  0x81   :  { %1457 = vmatprep.subr.bf16.mxu1 %v1849_v0  ;;  %1449 = vmatprep.subr.bf16.mxu0 %v1849_v0  ;;  %vm1258_vm5 = vcmask 195584   ;;  %s1856_s17 = smov [#allocation14]  }
  0x82   :  { %s1342_s23 = sshll.u32 %s1856_s17, 4  ;;  %s1343_s23 = int_to_ptr.vmem [resolvable:$true] %s1342_s23 }
  0x83   :  { %s1806_s2 = scalar_lea.vmem %s1343_s23, 256  ;;  %p1811_p1 = scmp.lt.s32.totalorder %s1343_s23, %s1343_s23 }
  0x84   :  { %1458 = vmatpush3.bf16.msra.mxu1 %v1610_v2  ;;  %1450 = vmatpush3.bf16.msra.mxu0 %v1613_v4  ;;  %p1807_p0 = scmp.ne.s32.totalorder %s1343_s23, %s1806_s2  ;;  %p1812_p2 = scmp.lt.s32.totalorder %s1806_s2, %s1806_s2 }
  0x85   :  { %1471 = vmatprep.subr.bf16.mxu1 %v1849_v0  ;;  %1463 = vmatprep.subr.bf16.mxu0 %v1849_v0 }
  0x86   :  { %p1813_p3 = por %p1812_p2, %p1811_p1 }
  0x87   :  { %1460 = vmatmul.mubr.msk.bf16.vlgmr.msra.gmra.mrb[0].mxu1 %vm152_vm1, %v1612_v5  ;;  %1452 = vmatmul.mubr.msk.bf16.vlgmr.msra.gmra.mrb[0].mxu0 %vm152_vm1, %v1614_v6 }
  0x88   :  { %1473 = vmatprep.mubr.msk.bf16.mxu1 %vm1850_vm0, %v1849_v0  ;;  %1464 = vmatpush3.bf16.msra.mxu0 %v1615_v7  ;;  %p1814_p4 = pnand %p1813_p3, %p1807_p0 }
  0x89   :  { %1467 = vmatprep.mubr.msk.bf16.mxu0 %vm1850_vm0, %v1849_v0  ;;  %1465 = vmatprep.subr.bf16.mxu0 %v1849_v0 }
  0x8c   :  { %1466 = vmatpush3.bf16.msra.mxu0 %v1616_v8 }
  0x8d   :  { %1477 = vmatprep.subr.bf16.mxu0 %v1849_v0 }
  0x8f   :  { %1468 = vmatmul.mubr.msk.bf16.vlgmr.msra.gmra.mrb[4].mxu0 %vm152_vm1, %v1617_v9 }
  0x90   :  { %1479 = vmatprep.mubr.msk.bf16.mxu0 %vm1850_vm0, %v1849_v0 }
 0x15a   :  { %v263_v10 = vpop.f32.mrb[0].mxu1  ;;  %v190_v14 = vpop.f32.mrb[0].mxu0 }
 0x15b   :  { %v2060_v11 = vpack.c.bf16 %v263_v10, %v263_v10  ;;  %v1461_v12 = vpop.f32.mrb[1].mxu1  ;;  %v1453_v18 = vpop.f32.mrb[1].mxu0  ;;  %v2071_v22 = vpack.c.bf16 %v190_v14, %v190_v14 }
 0x15c   :  { %v266_v13 = vpop.f32.mrb[2].mxu1  ;;  %v193_v19 = vpop.f32.mrb[2].mxu0 }
 0x15d   :  { %v2062_v15 = vpack.c.bf16 %v266_v13, %v266_v13  ;;  %v1462_v16 = vpop.f32.mrb[3].mxu1  ;;  %v356_v17 = vsel %vm351_vm2, %v2060_v11, 0  ;;  %v1454_v21 = vpop.f32.mrb[3].mxu0  ;;  %v2074_v23 = vpack.c.bf16 %v193_v19, %v193_v19 }
 0x15e   :  { %1472 = vmatpush3.bf16.xpose.msra.mxu1 %v356_v17 }
 0x15f   :  { %615 = vrot.lane.b32.xlu1 %v2062_v15, %s1851_s5  ;;  %v402_v20 = vsel %vm351_vm2, %v2062_v15, 0  ;;  %1483 = vmatprep.subr.bf16.mxu1 %v1849_v0 }
 0x160   :  { %1478 = vmatpush3.bf16.xpose.msra.mxu0 %v402_v20 }
 0x161   :  { %1489 = vmatprep.subr.bf16.mxu0 %v1849_v0 }
 0x162   :  { %v336_v24 = vpop.f32.mrb[4].mxu0 }
 0x163   :  { %v1469_v25 = vpop.f32.mrb[5].mxu0  ;;  %v2084_v26 = vpack.c.bf16 %v336_v24, %v336_v24 }
 0x164   :  { %v339_v27 = vpop.f32.mrb[6].mxu0 }
 0x165   :  { %1474 = vmatmul.mubr.msk.bf16.vlgmr.msra.gmra.mrb[4].mxu1 %vm351_vm2, %v2071_v22  ;;  %v2086_v28 = vpack.c.bf16 %v339_v27, %v339_v27  ;;  %v1470_v29 = vpop.f32.mrb[7].mxu0  ;;  %v475_v30 = vsel %vm473_vm3, %v2084_v26, 0 }
 0x166   :  { %1485 = vmatprep.mubr.msk.bf16.mxu1 %vm1850_vm0, %v1849_v0  ;;  %1484 = vmatpush3.bf16.msra.mxu1 %v475_v30 }
 0x167   :  { %1480 = vmatmul.mubr.msk.bf16.vlgmr.msra.gmra.mrb[8].mxu0 %vm351_vm2, %v2074_v23  ;;  %v521_v31 = vsel %vm473_vm3, %v2086_v28, 0  ;;  %1495 = vmatprep.subr.bf16.mxu1 %v1849_v0 }
 0x168   :  { %1491 = vmatprep.mubr.msk.bf16.mxu0 %vm1850_vm0, %v1849_v0  ;;  %1490 = vmatpush3.bf16.msra.mxu0 %v521_v31 }
 0x169   :  { %1501 = vmatprep.subr.bf16.mxu0 %v1849_v0 }
 0x1d1   :  { %v616_v58 = vpop.permute.xlu1 %615 }
 0x1d2   :  { %v621_v6 = vsel %vm351_vm2, %v616_v58, 0 }
 0x238   :  { %v392_v33 = vpop.f32.mrb[4].mxu1 }
 0x239   :  { %v393_v35 = vadd.f32 %v392_v33, %v2094_v32  ;;  %v1475_v36 = vpop.f32.mrb[5].mxu1 }
 0x23a   :  { %v395_v37 = vpop.f32.mrb[6].mxu1  ;;  %v438_v38 = vpop.f32.mrb[8].mxu0 }
 0x23b   :  { %v444_v39 = vmul.f32 0.17677669, %v393_v35  ;;  %v439_v40 = vadd.f32 %v438_v38, %v2096_v34  ;;  %v1476_v41 = vpop.f32.mrb[7].mxu1  ;;  %v1481_v42 = vpop.f32.mrb[9].mxu0 }
 0x23c   :  { %v441_v43 = vpop.f32.mrb[10].mxu0 }
 0x23d   :  { %v445_v44 = vmul.f32 0.17677669, %v439_v40  ;;  %v1482_v45 = vpop.f32.mrb[11].mxu0  ;;  %v446_v46 = vsel %vm351_vm2, %v444_v39, -inf }
 0x23e   :  { %447 = vmax.xlane.f32.xlu0 %v446_v46 }
 0x23f   :  { %v449_v47 = vsel %vm351_vm2, %v445_v44, -inf }
 0x242   :  { %450 = vmax.xlane.f32.xlu0 %v449_v47 }
 0x258   :  { %565 = vrot.lane.b32.xlu0 %v2060_v11, %s1851_s5 }
 0x2cb   :  { %v448_v48 = vpop.xlane.xlu0 %447 }
 0x2cc   :  { %v452_v49 = vsub.f32 %v444_v39, %v448_v48 }
 0x2ce   :  { %v454_v50 = vmul.f32 1.442695, %v452_v49 }
 0x2cf   :  { %v451_v51 = vpop.xlane.xlu0 %450 }
 0x2d0   :  { %1620 = vpow2.f32 %v454_v50  ;;  %v453_v52 = vsub.f32 %v445_v44, %v451_v51 }
 0x2d2   :  { %v456_v53 = vmul.f32 1.442695, %v453_v52 }
 0x2d3   :  { %v566_v63 = vpop.permute.xlu0 %565 }
 0x2d4   :  { %1622 = vpow2.f32 %v456_v53  ;;  %v571_v3 = vsel %vm351_vm2, %v566_v63, 0 }
 0x2da   :  { %v1621_v54 = vpop.eup %1620 }
 0x2db   :  { %v458_v55 = vsel %vm351_vm2, %v1621_v54, 0.0 }
 0x2dc   :  { %459 = vadd.xlane.f32.xlu1 %v458_v55 }
 0x2de   :  { %v1623_v56 = vpop.eup %1622 }
 0x2df   :  { %v461_v57 = vsel %vm351_vm2, %v1623_v56, 0.0 }
 0x2e0   :  { %462 = vadd.xlane.f32.xlu1 %v461_v57 }
 0x2f1   :  { %563 = vrot.lane.b32.xlu1 %v2071_v22, %s1851_s5 }
 0x2f5   :  { %613 = vrot.lane.b32.xlu1 %v2074_v23, %s1851_s5 }
 0x369   :  { %v460_v59 = vpop.xlane.xlu1 %459 }
 0x36a   :  { %1624 = vrcp.f32 %v460_v59 }
 0x36d   :  { %v463_v60 = vpop.xlane.xlu1 %462 }
 0x36e   :  { %1626 = vrcp.f32 %v463_v60 }
 0x371   :  { %v564_v7 = vpop.permute.xlu1 %563 }
 0x374   :  { %v1625_v61 = vpop.eup %1624 }
 0x375   :  { %v466_v62 = vmul.f32 %v1625_v61, %v1621_v54  ;;  %v614_v8 = vpop.permute.xlu1 %613 }
 0x377   :  { %v468_v1 = vpack.c.bf16 %v466_v62, %v466_v62 }
 0x378   :  { %v1627_v2 = vpop.eup %1626 }
 0x379   :  { %v467_v4 = vmul.f32 %v1627_v2, %v1623_v56  ;;  %1486 = vmatmul.mubr.msk.bf16.vlgmr.msra.gmra.mrb[8].mxu1 %vm351_vm2, %v468_v1 }
 0x37a   :  { %1496 = vmatpush3.bf16.xpose.msra.mxu1 %v571_v3  ;;  %1497 = vmatprep.mubr.msk.bf16.mxu1 %vm1850_vm0, %v1849_v0 }
 0x37b   :  { %v469_v5 = vpack.c.bf16 %v467_v4, %v467_v4  ;;  %1507 = vmatprep.subr.bf16.mxu1 %v1849_v0 }
 0x37d   :  { %1492 = vmatmul.mubr.msk.bf16.vlgmr.msra.gmra.mrb[12].mxu0 %vm351_vm2, %v469_v5 }
 0x37e   :  { %1502 = vmatpush3.bf16.xpose.msra.mxu0 %v621_v6  ;;  %1503 = vmatprep.mubr.msk.bf16.mxu0 %vm1850_vm0, %v1849_v0 }
 0x37f   :  { %1513 = vmatprep.subr.bf16.mxu0 %v1849_v0 }
 0x381   :  { %1498 = vmatmul.mubr.msk.bf16.vlgmr.msra.gmra.mrb[12].mxu1 %vm351_vm2, %v564_v7 }
 0x382   :  { %1509 = vmatprep.mubr.msk.bf16.mxu1 %vm1850_vm0, %v1849_v0 }
 0x385   :  { %1504 = vmatmul.mubr.msk.bf16.vlgmr.msra.gmra.mrb[16].mxu0 %vm351_vm2, %v614_v8 }
 0x386   :  { %1515 = vmatprep.mubr.msk.bf16.mxu0 %vm1850_vm0, %v1849_v0 }
 0x44c   :  { %v2126_v9 = vpop.f32.mrb[8].mxu1 }
 0x44d   :  { %v1487_v10 = vpop.f32.mrb[9].mxu1 }
 0x44e   :  { %v514_v12 = vpop.f32.mrb[10].mxu1 }
 0x44f   :  { %v1488_v13 = vpop.f32.mrb[11].mxu1 }
 0x450   :  { %v2128_v14 = vpop.f32.mrb[12].mxu0 }
 0x451   :  { %v1493_v16 = vpop.f32.mrb[13].mxu0 }
 0x452   :  { %v560_v17 = vpop.f32.mrb[14].mxu0 }
 0x453   :  { %v1494_v18 = vpop.f32.mrb[15].mxu0 }
 0x454   :  { %v607_v19 = vpop.f32.mrb[12].mxu1 }
 0x455   :  { %v608_v20 = vadd.f32 %v607_v19, %v2094_v32  ;;  %v1499_v21 = vpop.f32.mrb[13].mxu1 }
 0x456   :  { %v610_v24 = vpop.f32.mrb[14].mxu1 }
 0x457   :  { %v663_v25 = vmul.f32 0.17677669, %v608_v20  ;;  %v1500_v27 = vpop.f32.mrb[15].mxu1 }
 0x458   :  { %v657_v29 = vpop.f32.mrb[16].mxu0 }
 0x459   :  { %v658_v30 = vadd.f32 %v657_v29, %v2096_v34  ;;  %v1505_v31 = vpop.f32.mrb[17].mxu0  ;;  %v665_v33 = vsel %vm351_vm2, %v663_v25, -inf }
 0x45a   :  { %666 = vmax.xlane.f32.xlu0 %v665_v33  ;;  %v660_v35 = vpop.f32.mrb[18].mxu0 }
 0x45b   :  { %v664_v36 = vmul.f32 0.17677669, %v658_v30  ;;  %v1506_v37 = vpop.f32.mrb[19].mxu0 }
 0x45d   :  { %v668_v38 = vsel %vm351_vm2, %v664_v36, -inf }
 0x45e   :  { %669 = vmax.xlane.f32.xlu1 %v668_v38 }
 0x46f   :  { %737 = vrot.lane.b32.xlu1 %v2086_v28, %s1851_s5 }
 0x473   :  { %787 = vrot.lane.b32.xlu1 %v2060_v11, %s1852_s14 }
 0x477   :  { %837 = vrot.lane.b32.xlu1 %v2062_v15, %s1852_s14 }
 0x47b   :  { %835 = vrot.lane.b32.xlu1 %v2074_v23, %s1852_s14 }
 0x4e7   :  { %v667_v39 = vpop.xlane.xlu0 %666 }
 0x4e8   :  { %v671_v40 = vsub.f32 %v663_v25, %v667_v39 }
 0x4ea   :  { %v673_v41 = vmul.f32 1.442695, %v671_v40 }
 0x4eb   :  { %v670_v42 = vpop.xlane.xlu1 %669 }
 0x4ec   :  { %1628 = vpow2.f32 %v673_v41  ;;  %v672_v43 = vsub.f32 %v664_v36, %v670_v42 }
 0x4ee   :  { %v675_v44 = vmul.f32 1.442695, %v672_v43 }
 0x4ef   :  { %v738_v45 = vpop.permute.xlu1 %737 }
 0x4f0   :  { %1630 = vpow2.f32 %v675_v44  ;;  %v743_v46 = vsel %vm473_vm3, %v738_v45, 0 }
 0x4f1   :  { %1514 = vmatpush3.bf16.msra.mxu0 %v743_v46 }
 0x4f2   :  { %1525 = vmatprep.subr.bf16.mxu0 %v1849_v0 }
 0x4f3   :  { %v788_v56 = vpop.permute.xlu1 %787 }
 0x4f4   :  { %v793_v62 = vsel %vm351_vm2, %v788_v56, 0 }
 0x4f6   :  { %v1629_v47 = vpop.eup %1628 }
 0x4f7   :  { %v677_v48 = vsel %vm351_vm2, %v1629_v47, 0.0  ;;  %v838_v61 = vpop.permute.xlu1 %837 }
 0x4f8   :  { %678 = vadd.xlane.f32.xlu0 %v677_v48  ;;  %v843_v1 = vsel %vm351_vm2, %v838_v61, 0 }
 0x4fa   :  { %v1631_v49 = vpop.eup %1630 }
 0x4fb   :  { %v680_v50 = vsel %vm351_vm2, %v1631_v49, 0.0  ;;  %v836_v3 = vpop.permute.xlu1 %835 }
 0x4fc   :  { %681 = vadd.xlane.f32.xlu0 %v680_v50 }
 0x512   :  { %689 = vrot.lane.b32.xlu0 %v2084_v26, %s1851_s5 }
 0x516   :  { %785 = vrot.lane.b32.xlu0 %v2071_v22, %s1852_s14 }
 0x585   :  { %v679_v51 = vpop.xlane.xlu0 %678 }
 0x586   :  { %1632 = vrcp.f32 %v679_v51 }
 0x589   :  { %v682_v52 = vpop.xlane.xlu0 %681 }
 0x58a   :  { %1634 = vrcp.f32 %v682_v52 }
 0x58d   :  { %v690_v53 = vpop.permute.xlu0 %689 }
 0x58e   :  { %v695_v54 = vsel %vm473_vm3, %v690_v53, 0 }
 0x58f   :  { %1508 = vmatpush3.bf16.msra.mxu1 %v695_v54 }
 0x590   :  { %v1633_v55 = vpop.eup %1632  ;;  %1519 = vmatprep.subr.bf16.mxu1 %v1849_v0 }
 0x591   :  { %v685_v57 = vmul.f32 %v1633_v55, %v1629_v47  ;;  %v786_v2 = vpop.permute.xlu0 %785 }
 0x593   :  { %v687_v58 = vpack.c.bf16 %v685_v57, %v685_v57 }
 0x594   :  { %v1635_v59 = vpop.eup %1634 }
 0x595   :  { %v686_v60 = vmul.f32 %v1635_v59, %v1631_v49  ;;  %1510 = vmatmul.mubr.msk.bf16.vlgmr.msra.gmra.mrb[16].mxu1 %vm351_vm2, %v687_v58 }
 0x596   :  { %1521 = vmatprep.mubr.msk.bf16.mxu1 %vm1850_vm0, %v1849_v0 }
 0x597   :  { %v688_v63 = vpack.c.bf16 %v686_v60, %v686_v60 }
 0x598   :  { %1520 = vmatpush3.bf16.xpose.msra.mxu1 %v793_v62 }
 0x599   :  { %1516 = vmatmul.mubr.msk.bf16.vlgmr.msra.gmra.mrb[20].mxu0 %vm351_vm2, %v688_v63  ;;  %1531 = vmatprep.subr.bf16.mxu1 %v1849_v0 }
 0x59a   :  { %1526 = vmatpush3.bf16.xpose.msra.mxu0 %v843_v1  ;;  %1527 = vmatprep.mubr.msk.bf16.mxu0 %vm1850_vm0, %v1849_v0 }
 0x59b   :  { %1537 = vmatprep.subr.bf16.mxu0 %v1849_v0 }
 0x59f   :  { %1522 = vmatmul.mubr.msk.bf16.vlgmr.msra.gmra.mrb[20].mxu1 %vm351_vm2, %v786_v2 }
 0x5a0   :  { %1533 = vmatprep.mubr.msk.bf16.mxu1 %vm1850_vm0, %v1849_v0 }
 0x5a1   :  { %1528 = vmatmul.mubr.msk.bf16.vlgmr.msra.gmra.mrb[24].mxu0 %vm351_vm2, %v836_v3 }
 0x5a2   :  { %1539 = vmatprep.mubr.msk.bf16.mxu0 %vm1850_vm0, %v1849_v0 }
 0x668   :  { %v2168_v4 = vpop.f32.mrb[16].mxu1 }
 0x669   :  { %v1511_v5 = vpop.f32.mrb[17].mxu1 }
 0x66a   :  { %v734_v6 = vpop.f32.mrb[18].mxu1 }
 0x66b   :  { %v1512_v7 = vpop.f32.mrb[19].mxu1 }
 0x66c   :  { %v2170_v8 = vpop.f32.mrb[20].mxu0 }
 0x66d   :  { %v1594_v10 = vpack.i.bf16 %v2170_v8, %v2168_v4  ;;  %v1517_v12 = vpop.f32.mrb[21].mxu0 }
 0x66e   :  { %v782_v13 = vpop.f32.mrb[22].mxu0 }
 0x66f   :  { %v1518_v16 = vpop.f32.mrb[23].mxu0 }
 0x672   :  { %v829_v17 = vpop.f32.mrb[20].mxu1 }
 0x673   :  { %v830_v18 = vadd.f32 %v829_v17, %v2094_v32  ;;  %v1523_v19 = vpop.f32.mrb[21].mxu1 }
 0x674   :  { %v832_v20 = vpop.f32.mrb[22].mxu1  ;;  %v879_v21 = vpop.f32.mrb[24].mxu0 }
 0x675   :  { %v885_v24 = vmul.f32 0.17677669, %v830_v18  ;;  %v880_v25 = vadd.f32 %v879_v21, %v2096_v34  ;;  %v1524_v27 = vpop.f32.mrb[23].mxu1  ;;  %v1529_v29 = vpop.f32.mrb[25].mxu0 }
 0x676   :  { %v882_v30 = vpop.f32.mrb[26].mxu0 }
 0x677   :  { %v886_v31 = vmul.f32 0.17677669, %v880_v25  ;;  %v1530_v33 = vpop.f32.mrb[27].mxu0  ;;  %v887_v35 = vsel %vm351_vm2, %v885_v24, -inf }
 0x678   :  { %888 = vmax.xlane.f32.xlu0 %v887_v35 }
 0x679   :  { %v890_v36 = vsel %vm351_vm2, %v886_v31, -inf }
 0x67a   :  { %891 = vmax.xlane.f32.xlu1 %v890_v36 }
 0x68b   :  { %959 = vrot.lane.b32.xlu1 %v2086_v28, %s1852_s14 }
 0x68f   :  { %1009 = vrot.lane.b32.xlu1 %v2060_v11, %s1853_s15 }
 0x693   :  { %1059 = vrot.lane.b32.xlu1 %v2062_v15, %s1853_s15 }
 0x697   :  { %1057 = vrot.lane.b32.xlu1 %v2074_v23, %s1853_s15 }
 0x705   :  { %v889_v37 = vpop.xlane.xlu0 %888 }
 0x706   :  { %v893_v38 = vsub.f32 %v885_v24, %v889_v37 }
 0x707   :  { %v892_v39 = vpop.xlane.xlu1 %891 }
 0x708   :  { %v895_v40 = vmul.f32 1.442695, %v893_v38  ;;  %v894_v41 = vsub.f32 %v886_v31, %v892_v39 }
 0x70a   :  { %1636 = vpow2.f32 %v895_v40  ;;  %v897_v42 = vmul.f32 1.442695, %v894_v41 }
 0x70b   :  { %v960_v43 = vpop.permute.xlu1 %959 }
 0x70c   :  { %1638 = vpow2.f32 %v897_v42  ;;  %v965_v44 = vsel %vm473_vm3, %v960_v43, 0 }
 0x70d   :  { %1538 = vmatpush3.bf16.msra.mxu0 %v965_v44 }
 0x70e   :  { %1549 = vmatprep.subr.bf16.mxu0 %v1849_v0 }
 0x70f   :  { %v1010_v51 = vpop.permute.xlu1 %1009 }
 0x713   :  { %v1060_v56 = vpop.permute.xlu1 %1059 }
 0x714   :  { %v1637_v11 = vpop.eup %1636  ;;  %v1065_v58 = vsel %vm351_vm2, %v1060_v56, 0 }
 0x715   :  { %v899_v15 = vsel %vm351_vm2, %v1637_v11, 0.0 }
 0x716   :  { %v1639_v45 = vpop.eup %1638  ;;  %900 = vadd.xlane.f32.xlu0 %v899_v15 }
 0x717   :  { %v902_v23 = vsel %vm351_vm2, %v1639_v45, 0.0  ;;  %v1058_v60 = vpop.permute.xlu1 %1057 }
 0x71a   :  { %903 = vadd.xlane.f32.xlu0 %v902_v23 }
 0x730   :  { %911 = vrot.lane.b32.xlu0 %v2084_v26, %s1852_s14 }
 0x734   :  { %1007 = vrot.lane.b32.xlu0 %v2071_v22, %s1853_s15  ;;  %v1015_v22 = vsel %vm351_vm2, %v1010_v51, 0 }
 0x7a3   :  { %v901_v46 = vpop.xlane.xlu0 %900 }
 0x7a4   :  { %1640 = vrcp.f32 %v901_v46  ;;  %v1618_v46 = vld [vmem:[#allocation13] sm:$0xff]  }
 0x7a7   :  { %v904_v47 = vpop.xlane.xlu0 %903 }
 0x7a8   :  { %1642 = vrcp.f32 %v904_v47  ;;  %v1619_v47 = vld [vmem:[#allocation13 + $0x8] sm:$0xff]  }
 0x7ab   :  { %v912_v48 = vpop.permute.xlu0 %911 }
 0x7ac   :  { %v917_v49 = vsel %vm473_vm3, %v912_v48, 0 }
 0x7ad   :  { %1532 = vmatpush3.bf16.msra.mxu1 %v917_v49 }
 0x7ae   :  { %v1641_v50 = vpop.eup %1640  ;;  %1543 = vmatprep.subr.bf16.mxu1 %v1849_v0 }
 0x7af   :  { %v907_v52 = vmul.f32 %v1641_v50, %v1637_v11  ;;  %v1008_v59 = vpop.permute.xlu0 %1007 }
 0x7b1   :  { %v909_v53 = vpack.c.bf16 %v907_v52, %v907_v52 }
 0x7b2   :  { %v1643_v54 = vpop.eup %1642 }
 0x7b3   :  { %v908_v55 = vmul.f32 %v1643_v54, %v1639_v45  ;;  %1534 = vmatmul.mubr.msk.bf16.vlgmr.msra.gmra.mrb[24].mxu1 %vm351_vm2, %v909_v53 }
 0x7b4   :  { %1545 = vmatprep.mubr.msk.bf16.mxu1 %vm1850_vm0, %v1849_v0 }
 0x7b5   :  { %v910_v57 = vpack.c.bf16 %v908_v55, %v908_v55 }
 0x7b6   :  { %1544 = vmatpush3.bf16.xpose.msra.mxu1 %v1015_v22 }
 0x7b7   :  { %1540 = vmatmul.mubr.msk.bf16.vlgmr.msra.gmra.mrb[28].mxu0 %vm351_vm2, %v910_v57  ;;  %1555 = vmatprep.subr.bf16.mxu1 %v1849_v0 }
 0x7b8   :  { %1550 = vmatpush3.bf16.xpose.msra.mxu0 %v1065_v58  ;;  %1551 = vmatprep.mubr.msk.bf16.mxu0 %vm1850_vm0, %v1849_v0 }
 0x7b9   :  { %1561 = vmatprep.subr.bf16.mxu0 %v1849_v0 }
 0x7bd   :  { %1546 = vmatmul.mubr.msk.bf16.vlgmr.msra.gmra.mrb[28].mxu1 %vm351_vm2, %v1008_v59 }
 0x7be   :  { %1557 = vmatprep.mubr.msk.bf16.mxu1 %vm1850_vm0, %v1849_v0 }
 0x7bf   :  { %1552 = vmatmul.mubr.msk.bf16.vlgmr.msra.gmra.mrb[32].mxu0 %vm351_vm2, %v1058_v60 }
 0x7c0   :  { %1563 = vmatprep.mubr.msk.bf16.mxu0 %vm1850_vm0, %v1849_v0 }
 0x886   :  { %v953_v61 = vpop.f32.mrb[24].mxu1 }
 0x887   :  { %v1535_v62 = vpop.f32.mrb[25].mxu1 }
 0x888   :  { %v956_v63 = vpop.f32.mrb[26].mxu1 }
 0x889   :  { %v1536_v1 = vpop.f32.mrb[27].mxu1 }
 0x88a   :  { %v1001_v2 = vpop.f32.mrb[28].mxu0 }
 0x88b   :  { %v1599_v3 = vpack.i.bf16 %v1001_v2, %v953_v61  ;;  %v1541_v5 = vpop.f32.mrb[29].mxu0 }
 0x88c   :  { %v1004_v6 = vpop.f32.mrb[30].mxu0 }
 0x88d   :  { %v1542_v7 = vpop.f32.mrb[31].mxu0 }
 0x890   :  { %v1051_v12 = vpop.f32.mrb[28].mxu1 }
 0x891   :  { %v1052_v13 = vadd.f32 %v1051_v12, %v2094_v32  ;;  %v1547_v16 = vpop.f32.mrb[29].mxu1 }
 0x892   :  { %v1054_v17 = vpop.f32.mrb[30].mxu1  ;;  %v1101_v18 = vpop.f32.mrb[32].mxu0 }
 0x893   :  { %v1107_v19 = vmul.f32 0.17677669, %v1052_v13  ;;  %v1102_v20 = vadd.f32 %v1101_v18, %v2096_v34  ;;  %v1548_v21 = vpop.f32.mrb[31].mxu1  ;;  %v1553_v24 = vpop.f32.mrb[33].mxu0  ;;  %v1391_v13 = vld [vmem:[%s2267_s8] ss:$0 sm:$0xff] }
 0x894   :  { %v1104_v25 = vpop.f32.mrb[34].mxu0 }
 0x895   :  { %v1108_v27 = vmul.f32 0.17677669, %v1102_v20  ;;  %v1554_v29 = vpop.f32.mrb[35].mxu0  ;;  %v1109_v30 = vsel %vm351_vm2, %v1107_v19, -inf }
 0x896   :  { %1110 = vmax.xlane.f32.xlu0 %v1109_v30 }
 0x897   :  { %v1112_v31 = vsel %vm351_vm2, %v1108_v27, -inf }
 0x898   :  { %1113 = vmax.xlane.f32.xlu1 %v1112_v31 }
 0x8a9   :  { %1181 = vrot.lane.b32.xlu1 %v2086_v28, %s1853_s15 }
 0x8ad   :  { %1595 = vrot.lane.b32.xlu1 %v1594_v10, %s1843_s10 }
 0x8b1   :  { %1600 = vrot.lane.b32.xlu1 %v1599_v3, %s1854_s16 }
 0x923   :  { %v1111_v32 = vpop.xlane.xlu0 %1110 }
 0x924   :  { %v1115_v34 = vsub.f32 %v1107_v19, %v1111_v32 }
 0x925   :  { %v1114_v33 = vpop.xlane.xlu1 %1113 }
 0x926   :  { %v1117_v35 = vmul.f32 1.442695, %v1115_v34  ;;  %v1116_v36 = vsub.f32 %v1108_v27, %v1114_v33 }
 0x928   :  { %1644 = vpow2.f32 %v1117_v35  ;;  %v1119_v37 = vmul.f32 1.442695, %v1116_v36 }
 0x929   :  { %v1182_v38 = vpop.permute.xlu1 %1181 }
 0x92a   :  { %1646 = vpow2.f32 %v1119_v37  ;;  %v1187_v39 = vsel %vm473_vm3, %v1182_v38, 0 }
 0x92b   :  { %1562 = vmatpush3.bf16.msra.mxu0 %v1187_v39 }
 0x92d   :  { %v1596_v22 = vpop.permute.xlu1 %1595 }
 0x92e   :  { %v1598_v58 = vunpack.i.h.bf16 %v1596_v22  ;;  %v1597_v59 = vunpack.i.l.bf16 %v1596_v22 }
 0x930   :  { %v1254_v62 = vsel %vm351_vm2, %v2128_v14, %v1598_v58  ;;  %v1253_v63 = vsel %vm351_vm2, %v2126_v9, %v1597_v59 }
 0x931   :  { %v1601_v57 = vpop.permute.xlu1 %1600 }
 0x932   :  { %v1645_v28 = vpop.eup %1644  ;;  %v1603_v60 = vunpack.i.h.bf16 %v1601_v57  ;;  %v1602_v61 = vunpack.i.l.bf16 %v1601_v57 }
 0x933   :  { %v1121_v40 = vsel %vm351_vm2, %v1645_v28, 0.0 }
 0x934   :  { %v1647_v41 = vpop.eup %1646  ;;  %1122 = vadd.xlane.f32.xlu0 %v1121_v40  ;;  %v1256_v3 = vsel %vm1255_vm4, %v1253_v63, %v1602_v61  ;;  %v1257_v5 = vsel %vm1255_vm4, %v1254_v62, %v1603_v60 }
 0x935   :  { %v1124_v4 = vsel %vm351_vm2, %v1647_v41, 0.0 }
 0x938   :  { %1125 = vadd.xlane.f32.xlu0 %v1124_v4 }
 0x94e   :  { %1133 = vrot.lane.b32.xlu0 %v2084_v26, %s1853_s15 }
 0x9c1   :  { %v1123_v8 = vpop.xlane.xlu0 %1122 }
 0x9c2   :  { %1648 = vrcp.f32 %v1123_v8 }
 0x9c5   :  { %v1126_v10 = vpop.xlane.xlu0 %1125 }
 0x9c6   :  { %1650 = vrcp.f32 %v1126_v10 }
 0x9c9   :  { %v1134_v42 = vpop.permute.xlu0 %1133 }
 0x9ca   :  { %v1139_v43 = vsel %vm473_vm3, %v1134_v42, 0 }
 0x9cb   :  { %1556 = vmatpush3.bf16.msra.mxu1 %v1139_v43 }
 0x9cc   :  { %v1649_v44 = vpop.eup %1648  ;;  %1567 = vmatprep.subr.bf16.mxu1 %v1849_v0 }
 0x9cd   :  { %v1129_v11 = vmul.f32 %v1649_v44, %v1645_v28 }
 0x9cf   :  { %v1131_v15 = vpack.c.bf16 %v1129_v11, %v1129_v11 }
 0x9d0   :  { %v1651_v45 = vpop.eup %1650 }
 0x9d1   :  { %v1130_v23 = vmul.f32 %v1651_v45, %v1647_v41  ;;  %1558 = vmatmul.mubr.msk.bf16.vlgmr.msra.gmra.mrb[32].mxu1 %vm351_vm2, %v1131_v15 }
 0x9d2   :  { %1571 = vmatprep.mubr.msk.bf16.mxu1 %vm1850_vm0, %v1849_v0  ;;  %1568 = vmatpush3.bf16.msra.mxu1 %v1618_v46 }
 0x9d3   :  { %v1132_v26 = vpack.c.bf16 %v1130_v23, %v1130_v23  ;;  %1569 = vmatprep.subr.bf16.mxu1 %v1849_v0 }
 0x9d5   :  { %1564 = vmatmul.mubr.msk.bf16.vlgmr.msra.gmra.mrb[36].mxu0 %vm351_vm2, %v1132_v26 }
 0x9d6   :  { %1570 = vmatpush3.bf16.msra.mxu1 %v1619_v47 }
 0xaa4   :  { %v1175_v48 = vpop.f32.mrb[32].mxu1 }
 0xaa5   :  { %v1559_v49 = vpop.f32.mrb[33].mxu1 }
 0xaa6   :  { %v1178_v50 = vpop.f32.mrb[34].mxu1 }
 0xaa7   :  { %v1560_v51 = vpop.f32.mrb[35].mxu1 }
 0xaa8   :  { %v1223_v52 = vpop.f32.mrb[36].mxu0 }
 0xaa9   :  { %v1604_v53 = vpack.i.bf16 %v1223_v52, %v1175_v48  ;;  %v1565_v54 = vpop.f32.mrb[37].mxu0 }
 0xaaa   :  { %v1226_v55 = vpop.f32.mrb[38].mxu0 }
 0xaab   :  { %1605 = vrot.lane.b32.xlu0 %v1604_v53, %s1855_s18  ;;  %v1566_v56 = vpop.f32.mrb[39].mxu0 }
 0xb1d   :  { %v1606_v0 = vpop.permute.xlu0 %1605 }
 0xb1e   :  { %v1608_v1 = vunpack.i.h.bf16 %v1606_v0  ;;  %v1607_v2 = vunpack.i.l.bf16 %v1606_v0 }
 0xb20   :  { %v1260_v6 = vsel %vm1258_vm5, %v1257_v5, %v1608_v1  ;;  %v1259_v7 = vsel %vm1258_vm5, %v1256_v3, %v1607_v2 }
 0xb21   :  { %v1402_v12 = vpack.c.bf16 %v1260_v6, %v1259_v7 }
 0xb23   :  { %1572 = vmatmul.mubr.msk.bf16.vlgmr.msra.gmra.mrb[36].mxu1 %vm152_vm1, %v1402_v12 }
 0xbf6   :  { %v1328_v16 = vpop.f32.mrb[36].mxu1 }
 0xbf7   :  { %v1329_v14 = vadd.f32 %v1391_v13, %v1328_v16  ;;  %v1573_v17 = vpop.f32.mrb[37].mxu1 }
 0xbf8   :  { %v1331_v18 = vpop.f32.mrb[38].mxu1 }
 0xbf9   :  { %1335 = vst.msk [vmem:[#allocation14] sm:$0xff] %vm152_vm1, %v1329_v14  ;;  %v1332_v9 = vadd.f32 %v1391_v13, %v1331_v18  ;;  %v1574_v19 = vpop.f32.mrb[39].mxu1 }
 0xbfb   :  { %1336 = vst.msk [vmem:[#allocation14 + $0x8] sm:$0xff] %vm152_vm1, %v1332_v9 }
 0xbfc   :  { %1817 = shalt.err (!%p1814_p4)
}
 0xbfd   :  { %s1818_s25 = scalar_lea.hbm %s2268_s9, 256 }
 0xbfe   :  { %p1819_p5 = scmp.ne.s32.totalorder %s2268_s9, %s1818_s25  ;;  %p1822_p6 = scmp.lt.u32.totalorder %s1818_s25, %s2268_s9 }
 0xc00   :  { %p1824_p7 = pnand %p1822_p6, %p1819_p5 }
 0xc02   :  { %1827 = shalt.err (!%p1824_p7)
}
 0xc03   :  { %1348 = dma.vmem_to_hbm [thread:$0]  %s1343_s23, 256, %s2268_s9, [#allocation4], %s1842_s1, %s1842_s1, %s1843_s10  }
 0xc04   :  { %1836 = dma.done.wait [#allocation4], 256  }
 0xc05   :  { %1837 = vsyncadd [#allocation4], 4294967040 }
 0xc06   :  { %1352 = vsyncpa [#allocation3], 1 }
 0xc07   :  { %1353 = vsyncpa [#allocation6], 1 }
 0xc08   :  { %1354 = vsyncpa [#allocation9], 1 }
 0xc09   :  { %1355 = vsyncpa [#allocation12], 1 }
 0xc0a   :  { %1356 = vsyncpa [#allocation4], 1 }

</bundles_post_ra>
